<compile_context>
chip_gen: v7x
topology: tpu7x:2x2x1
jax: 0.10.0
libtpu: 0.0.40
codegen_flags: <defaults>
</compile_context>

<pallas_src>
import functools

import jax
import jax.numpy as jnp
from jax.experimental import pallas as pl
from jax.experimental.pallas import tpu as pltpu


LAYER_SHAPES = [(8, 128), (128, 128), (128, 64), (64, 2)]   # (fan_in, fan_out)
NUM_LAYERS = len(LAYER_SHAPES)
PAD = 128   # every layer zero-padded to 128x128 -> all tiles (8,128)-aligned


def mlp_kernel(x_ref, w_ref, b_ref, o_ref):
    # x_ref : (bb, 128) f32     (features zero-padded 8 -> 128)
    # w_ref : (4, 128, 128) bf16 packed, zero-padded (in, out) weights
    # b_ref : (4, 1, 128)   f32  packed, zero-padded biases
    # o_ref : (bb, 128) f32     (only columns [:2] meaningful)
    h = x_ref[...].astype(jnp.bfloat16)
    for l in range(NUM_LAYERS - 1):
        y = jnp.dot(h, w_ref[l], preferred_element_type=jnp.float32) + b_ref[l]
        h = jnp.tanh(y).astype(jnp.bfloat16)        # bias add + tanh in f32
    out = jnp.dot(h, w_ref[NUM_LAYERS - 1],
                  preferred_element_type=jnp.float32) + b_ref[NUM_LAYERS - 1]
    o_ref[...] = out.astype(o_ref.dtype)


def _round_up(n, m):
    return ((n + m - 1) // m) * m


@functools.partial(jax.jit, static_argnames=("block_b",))
def dqn_forward(x, w_packed, b_packed, *, block_b=1024):
    """x: (B, 8) f32 -> (B, 2) f32 action values."""
    B, F = x.shape
    bp = _round_up(B, 8)
    bb = min(block_b, bp)          # rows per grid step (multiple of 8)
    bp = _round_up(bp, bb)

    # Zero-pad batch -> bp and features -> 128; zeros pass exactly through the
    # zero-padded weights/biases, so padded rows/cols do not change the result.
    xp = jnp.zeros((bp, PAD), x.dtype).at[:B, :F].set(x)

    cost = pl.CostEstimate(
        flops=2 * bp * NUM_LAYERS * PAD * PAD,
        transcendentals=bp * (NUM_LAYERS - 1) * PAD,
        bytes_accessed=(xp.size + bp * PAD + b_packed.size) * 4 + w_packed.size * 2,
    )

    out = pl.pallas_call(
        mlp_kernel,
        out_shape=jax.ShapeDtypeStruct((bp, PAD), jnp.float32),
        grid_spec=pltpu.PrefetchScalarGridSpec(
            num_scalar_prefetch=0,
            grid=(bp // bb,),
            in_specs=[
                pl.BlockSpec((bb, PAD), lambda i: (i, 0)),
                pl.BlockSpec((NUM_LAYERS, PAD, PAD), lambda i: (0, 0, 0)),
                pl.BlockSpec((NUM_LAYERS, 1, PAD), lambda i: (0, 0, 0)),
            ],
            out_specs=pl.BlockSpec((bb, PAD), lambda i: (i, 0)),
        ),
        compiler_params=pltpu.CompilerParams(
            dimension_semantics=("parallel",)),
        cost_estimate=cost,
    )(xp, w_packed, b_packed)

    return out[:B, :2]


def init_params(key):
    """Mirror the PyTorch module: weights ~ N(0, 0.1) (stored transposed as
    (in, out)); biases keep torch's default Linear init U(-1/sqrt(fan_in), +)."""
    params = {}
    keys = jax.random.split(key, 2 * NUM_LAYERS)
    for i, (fan_in, fan_out) in enumerate(LAYER_SHAPES):
        wk, bk = keys[2 * i], keys[2 * i + 1]
        w = 0.1 * jax.random.normal(wk, (fan_in, fan_out), dtype=jnp.float32)
        bound = 1.0 / float(fan_in) ** 0.5
        b = jax.random.uniform(bk, (1, fan_out), dtype=jnp.float32,
                               minval=-bound, maxval=bound)
        params[f"w{i + 1}"] = w
        params[f"b{i + 1}"] = b
    return params


def pack_params(params):
    """Pack all 8 tensors into 2 contiguous 128-padded buffers.
    Weights stored bf16 (MXU inputs); biases stay f32."""
    w_packed = jnp.zeros((NUM_LAYERS, PAD, PAD), jnp.float32)
    b_packed = jnp.zeros((NUM_LAYERS, 1, PAD), jnp.float32)
    for i, (fan_in, fan_out) in enumerate(LAYER_SHAPES):
        w_packed = w_packed.at[i, :fan_in, :fan_out].set(params[f"w{i + 1}"])
        b_packed = b_packed.at[i, :, :fan_out].set(params[f"b{i + 1}"])
    return w_packed.astype(jnp.bfloat16), b_packed


def reference_forward_f32(x, params):
    h = x
    for i in range(1, NUM_LAYERS):
        h = jnp.tanh(h @ params[f"w{i}"] + params[f"b{i}"])
    return h @ params[f"w{NUM_LAYERS}"] + params[f"b{NUM_LAYERS}"]


def reference_forward_bf16(x, params):
    # Same numerics as the kernel: bf16 matmul inputs, f32 accumulate/bias/tanh.
    h = x.astype(jnp.bfloat16)
    for i in range(1, NUM_LAYERS):
        y = jnp.dot(h, params[f"w{i}"].astype(jnp.bfloat16),
                    preferred_element_type=jnp.float32) + params[f"b{i}"]
        h = jnp.tanh(y).astype(jnp.bfloat16)
    return jnp.dot(h, params[f"w{NUM_LAYERS}"].astype(jnp.bfloat16),
                   preferred_element_type=jnp.float32) + params[f"b{NUM_LAYERS}"]


if __name__ == "__main__":
    key = jax.random.PRNGKey(0)
    pkey, xkey = jax.random.split(key)

    params = init_params(pkey)
    w_packed, b_packed = pack_params(params)

    # Small deterministic batch: 8 states x 8 features.
    x = jax.random.normal(xkey, (8, 8), dtype=jnp.float32)

    out = jax.block_until_ready(dqn_forward(x, w_packed, b_packed))
    assert out.shape == (8, 2)

    ref_same_prec = reference_forward_bf16(x, params)
    ref_f32 = reference_forward_f32(x, params)
    assert jnp.allclose(out, ref_same_prec, atol=1e-4, rtol=1e-4), \
        "mismatch vs precision-matched (bf16-MXU) reference"
    assert jnp.allclose(out, ref_f32, atol=5e-2, rtol=5e-2), \
        "mismatch vs f32 reference"

    # Exercise the batch-padding path (B not a multiple of 8).
    out2 = jax.block_until_ready(dqn_forward(x[:5], w_packed, b_packed))
    assert out2.shape == (5, 2)
    assert jnp.allclose(out2, ref_same_prec[:5], atol=1e-4, rtol=1e-4)

    print("KERNEL_OK")
</pallas_src>

<mosaic_0001>
module attributes {stable_mosaic.version = 11 : i64} {
  func.func @mlp_kernel(%arg0: i32, %arg1: memref<8x128xf32, #tpu.memory_space<vmem>>, %arg2: memref<4x128x128xbf16, #tpu.memory_space<vmem>>, %arg3: memref<4x1x128xf32, #tpu.memory_space<vmem>>, %arg4: memref<8x128xf32, #tpu.memory_space<vmem>>) attributes {dimension_semantics = [#tpu.dimension_semantics<parallel>], iteration_bounds = array<i64: 1>, scalar_prefetch = 0 : i64, scratch_operands = 0 : i64, tpu.core_type = #tpu.core_type<tc>, window_params = [{transform_indices = @transform_0, window_bounds = array<i64: 8, 128>}, {pipeline_mode = #tpu.pipeline_mode<synchronous>, transform_indices = @transform_1, window_bounds = array<i64: 4, 128, 128>}, {pipeline_mode = #tpu.pipeline_mode<synchronous>, transform_indices = @transform_2, window_bounds = array<i64: 4, 1, 128>}, {transform_indices = @transform_3, window_bounds = array<i64: 8, 128>}]} {
    %c0 = arith.constant 0 : index
    %c0_0 = arith.constant 0 : index
    %0 = vector.load %arg1[%c0, %c0_0] : memref<8x128xf32, #tpu.memory_space<vmem>>, vector<8x128xf32>
    %1 = arith.truncf %0 : vector<8x128xf32> to vector<8x128xbf16>
    %c0_1 = arith.constant 0 : index
    %c0_2 = arith.constant 0 : index
    %c0_3 = arith.constant 0 : index
    %2 = vector.load %arg2[%c0_1, %c0_2, %c0_3] : memref<4x128x128xbf16, #tpu.memory_space<vmem>>, vector<1x128x128xbf16>
    %3 = vector.shape_cast %2 : vector<1x128x128xbf16> to vector<128x128xbf16>
    %cst = arith.constant dense<0.000000e+00> : vector<8x128xf32>
    %4 = tpu.matmul %1, %3, %cst {dimension_numbers = #tpu.dot_dimension_numbers<[1], [0], [0], [1], [0, 0, 1, 1], [], []>} : vector<8x128xbf16>, vector<128x128xbf16>, vector<8x128xf32> -> vector<8x128xf32>
    %c0_4 = arith.constant 0 : index
    %c0_5 = arith.constant 0 : index
    %c0_6 = arith.constant 0 : index
    %5 = vector.load %arg3[%c0_4, %c0_5, %c0_6] : memref<4x1x128xf32, #tpu.memory_space<vmem>>, vector<1x1x128xf32>
    %6 = vector.shape_cast %5 : vector<1x1x128xf32> to vector<1x128xf32>
    %7 = vector.broadcast %6 : vector<1x128xf32> to vector<8x128xf32>
    %8 = arith.addf %4, %7 : vector<8x128xf32>
    %9 = math.tanh %8 : vector<8x128xf32>
    %10 = arith.truncf %9 : vector<8x128xf32> to vector<8x128xbf16>
    %c1 = arith.constant 1 : index
    %c0_7 = arith.constant 0 : index
    %c0_8 = arith.constant 0 : index
    %11 = vector.load %arg2[%c1, %c0_7, %c0_8] : memref<4x128x128xbf16, #tpu.memory_space<vmem>>, vector<1x128x128xbf16>
    %12 = vector.shape_cast %11 : vector<1x128x128xbf16> to vector<128x128xbf16>
    %cst_9 = arith.constant dense<0.000000e+00> : vector<8x128xf32>
    %13 = tpu.matmul %10, %12, %cst_9 {dimension_numbers = #tpu.dot_dimension_numbers<[1], [0], [0], [1], [0, 0, 1, 1], [], []>} : vector<8x128xbf16>, vector<128x128xbf16>, vector<8x128xf32> -> vector<8x128xf32>
    %c1_10 = arith.constant 1 : index
    %c0_11 = arith.constant 0 : index
    %c0_12 = arith.constant 0 : index
    %14 = vector.load %arg3[%c1_10, %c0_11, %c0_12] : memref<4x1x128xf32, #tpu.memory_space<vmem>>, vector<1x1x128xf32>
    %15 = vector.shape_cast %14 : vector<1x1x128xf32> to vector<1x128xf32>
    %16 = vector.broadcast %15 : vector<1x128xf32> to vector<8x128xf32>
    %17 = arith.addf %13, %16 : vector<8x128xf32>
    %18 = math.tanh %17 : vector<8x128xf32>
    %19 = arith.truncf %18 : vector<8x128xf32> to vector<8x128xbf16>
    %c2 = arith.constant 2 : index
    %c0_13 = arith.constant 0 : index
    %c0_14 = arith.constant 0 : index
    %20 = vector.load %arg2[%c2, %c0_13, %c0_14] : memref<4x128x128xbf16, #tpu.memory_space<vmem>>, vector<1x128x128xbf16>
    %21 = vector.shape_cast %20 : vector<1x128x128xbf16> to vector<128x128xbf16>
    %cst_15 = arith.constant dense<0.000000e+00> : vector<8x128xf32>
    %22 = tpu.matmul %19, %21, %cst_15 {dimension_numbers = #tpu.dot_dimension_numbers<[1], [0], [0], [1], [0, 0, 1, 1], [], []>} : vector<8x128xbf16>, vector<128x128xbf16>, vector<8x128xf32> -> vector<8x128xf32>
    %c2_16 = arith.constant 2 : index
    %c0_17 = arith.constant 0 : index
    %c0_18 = arith.constant 0 : index
    %23 = vector.load %arg3[%c2_16, %c0_17, %c0_18] : memref<4x1x128xf32, #tpu.memory_space<vmem>>, vector<1x1x128xf32>
    %24 = vector.shape_cast %23 : vector<1x1x128xf32> to vector<1x128xf32>
    %25 = vector.broadcast %24 : vector<1x128xf32> to vector<8x128xf32>
    %26 = arith.addf %22, %25 : vector<8x128xf32>
    %27 = math.tanh %26 : vector<8x128xf32>
    %28 = arith.truncf %27 : vector<8x128xf32> to vector<8x128xbf16>
    %c3 = arith.constant 3 : index
    %c0_19 = arith.constant 0 : index
    %c0_20 = arith.constant 0 : index
    %29 = vector.load %arg2[%c3, %c0_19, %c0_20] : memref<4x128x128xbf16, #tpu.memory_space<vmem>>, vector<1x128x128xbf16>
    %30 = vector.shape_cast %29 : vector<1x128x128xbf16> to vector<128x128xbf16>
    %cst_21 = arith.constant dense<0.000000e+00> : vector<8x128xf32>
    %31 = tpu.matmul %28, %30, %cst_21 {dimension_numbers = #tpu.dot_dimension_numbers<[1], [0], [0], [1], [0, 0, 1, 1], [], []>} : vector<8x128xbf16>, vector<128x128xbf16>, vector<8x128xf32> -> vector<8x128xf32>
    %c3_22 = arith.constant 3 : index
    %c0_23 = arith.constant 0 : index
    %c0_24 = arith.constant 0 : index
    %32 = vector.load %arg3[%c3_22, %c0_23, %c0_24] : memref<4x1x128xf32, #tpu.memory_space<vmem>>, vector<1x1x128xf32>
    %33 = vector.shape_cast %32 : vector<1x1x128xf32> to vector<1x128xf32>
    %34 = vector.broadcast %33 : vector<1x128xf32> to vector<8x128xf32>
    %35 = arith.addf %31, %34 : vector<8x128xf32>
    %c0_25 = arith.constant 0 : index
    %c0_26 = arith.constant 0 : index
    %36 = vector.load %arg4[%c0_25, %c0_26] : memref<8x128xf32, #tpu.memory_space<vmem>>, vector<8x128xf32>
    tpu.vector_store %arg4[%c0_25, %c0_26], %35 {strides = array<i32>} : memref<8x128xf32, #tpu.memory_space<vmem>>, vector<8x128xf32>,
    return
  }
  func.func @transform_0(%arg0: i32) -> (i32, i32) {
    %c0_i32 = arith.constant 0 : i32
    %c0_i32_0 = arith.constant 0 : i32
    return %arg0, %c0_i32 : i32, i32
  }
  func.func @transform_1(%arg0: i32) -> (i32, i32, i32) {
    %c0_i32 = arith.constant 0 : i32
    %c0_i32_0 = arith.constant 0 : i32
    %c0_i32_1 = arith.constant 0 : i32
    %c0_i32_2 = arith.constant 0 : i32
    return %c0_i32, %c0_i32_0, %c0_i32_1 : i32, i32, i32
  }
  func.func @transform_2(%arg0: i32) -> (i32, i32, i32) {
    %c0_i32 = arith.constant 0 : i32
    %c0_i32_0 = arith.constant 0 : i32
    %c0_i32_1 = arith.constant 0 : i32
    %c0_i32_2 = arith.constant 0 : i32
    return %c0_i32, %c0_i32_0, %c0_i32_1 : i32, i32, i32
  }
  func.func @transform_3(%arg0: i32) -> (i32, i32) {
    %c0_i32 = arith.constant 0 : i32
    %c0_i32_0 = arith.constant 0 : i32
    return %arg0, %c0_i32 : i32, i32
  }
}

</mosaic_0001>

<bundles_post_ra>
// kernel: dqn_forward.1
= control target key start
LH: loop header
LB: loop body
LE: loop exit
PB: predicated region body
PF: predicated region fallthrough
CT: control target
= control target key end

     0   :  { %8 = vsyncpa [#allocation3], 0  ;;  %s715_s12 = smov [#allocation2]   ;;  %s810_s0 = inlined_call_operand.vmem [shape: f32[8,128], index: 0, kind: input, shape index: {}]   ;;  %s811_s1 = inlined_call_operand.hbm [shape: bf16[4,128,128], index: 1, kind: input, shape index: {}]   ;;  %s812_s2 = inlined_call_operand.vmem [shape: f32[4,1,128], index: 2, kind: input, shape index: {}]   ;;  %s813_s3 = inlined_call_operand.vmem [shape: f32[8,128], index: 3, kind: output, shape index: {}]  }
   0x1   :  { %s16_s13 = sshll.u32 %s715_s12, 4  ;;  %s691_s16 = scalar_lea.hbm %s811_s1, 4096  ;;  %s17_s13 = int_to_ptr.vmem [resolvable:$true] %s16_s13 }
   0x2   :  { %p692_p0 = scmp.ne.s32.totalorder %s811_s1, %s691_s16  ;;  %p695_p1 = scmp.lt.u32.totalorder %s691_s16, %s811_s1 }
   0x4   :  { %p697_p2 = pnand %p695_p1, %p692_p0 }
   0x6   :  { %700 = shalt.err (!%p697_p2)
}
   0x7   :  { %s701_s21 = scalar_lea.vmem %s17_s13, 4096  ;;  %p706_p4 = scmp.lt.s32.totalorder %s17_s13, %s17_s13 }
   0x8   :  { %p702_p3 = scmp.ne.s32.totalorder %s17_s13, %s701_s21  ;;  %p707_p5 = scmp.lt.s32.totalorder %s701_s21, %s701_s21 }
   0xa   :  { %p708_p6 = por %p707_p5, %p706_p4 }
   0xc   :  { %p709_p7 = pnand %p708_p6, %p702_p3 }
   0xe   :  { %712 = shalt.err (!%p709_p7)
}
   0xf   :  { %s716_s22 = smov 64   ;;  %s717_s23 = smov 4  }
  0x10   :  { %22 = dma.hbm_to_vmem [thread:$0]  %s811_s1, 4096, %s17_s13, [#allocation3], %s716_s22, %s716_s22, %s717_s23  }
  0x11   :  { %713 = dma.done.wait [#allocation3], 4096  }
  0x12   :  { %714 = vsyncadd [#allocation3], 4294963200  ;;  %v718_v0 = vmov 0.0   ;;  %vm719_vm0 = vmmov 0   ;;  %v653_v1 = vld [vmem:[#allocation2] sm:$0xff]   ;;  %v654_v2 = vld [vmem:[#allocation2 + $0x8] sm:$0xff]  }
  0x13   :  { %568 = vmatprep.subr.bf16.mxu0 %v718_v0  ;;  %584 = vmatprep.mubr.msk.bf16.mxu0 %vm719_vm0, %v718_v0  ;;  %v655_v3 = vld [vmem:[#allocation2 + $0x10] sm:$0xff]   ;;  %v661_v4 = vld [vmem:[#allocation2 + $0x40] sm:$0xff]   ;;  %v656_v5 = vld [vmem:[#allocation2 + $0x18] sm:$0xff]  }
  0x14   :  { %588 = vmatprep.subr.bf16.mxu1 %v718_v0  ;;  %604 = vmatprep.mubr.msk.bf16.mxu1 %vm719_vm0, %v718_v0  ;;  %v662_v6 = vld [vmem:[#allocation2 + $0x48] sm:$0xff]   ;;  %v657_v7 = vld [vmem:[#allocation2 + $0x20] sm:$0xff]   ;;  %v663_v8 = vld [vmem:[#allocation2 + $0x50] sm:$0xff]  }
  0x15   :  { %569 = vmatpush3.bf16.msra.mxu0 %v653_v1  ;;  %589 = vmatpush3.bf16.msra.mxu1 %v661_v4  ;;  %v658_v9 = vld [vmem:[#allocation2 + $0x28] sm:$0xff]   ;;  %v664_v10 = vld [vmem:[#allocation2 + $0x58] sm:$0xff]   ;;  %v659_v11 = vld [vmem:[#allocation2 + $0x30] sm:$0xff]  }
  0x16   :  { %570 = vmatprep.subr.bf16.mxu0 %v718_v0  ;;  %590 = vmatprep.subr.bf16.mxu1 %v718_v0  ;;  %v660_v12 = vld [vmem:[#allocation2 + $0x38] sm:$0xff]   ;;  %v29_v13 = vld [vmem:[%s810_s0] sm:$0xff]  ;;  %v666_v16 = vld [vmem:[#allocation2 + $0x68] sm:$0xff]  }
  0x17   :  { %v30_v14 = vpack.c.bf16 %v29_v13, %v29_v13  ;;  %v665_v15 = vld [vmem:[#allocation2 + $0x60] sm:$0xff]   ;;  %v667_v17 = vld [vmem:[#allocation2 + $0x70] sm:$0xff]   ;;  %v668_v18 = vld [vmem:[#allocation2 + $0x78] sm:$0xff]  }
  0x18   :  { %v669_v19 = vld [vmem:[#allocation2 + $0x80] sm:$0xff]   ;;  %v670_v20 = vld [vmem:[#allocation2 + $0x88] sm:$0xff]   ;;  %v671_v21 = vld [vmem:[#allocation2 + $0x90] sm:$0xff]  }
  0x19   :  { %571 = vmatpush3.bf16.msra.mxu0 %v654_v2  ;;  %591 = vmatpush3.bf16.msra.mxu1 %v662_v6  ;;  %v672_v22 = vld [vmem:[#allocation2 + $0x98] sm:$0xff]   ;;  %v493_v23 = vld [vmem:[%s812_s2] ss:$0 sm:$0xff]  ;;  %v674_v32 = vld [vmem:[#allocation2 + $0xa8] sm:$0xff]  }
  0x1a   :  { %572 = vmatprep.subr.bf16.mxu0 %v718_v0  ;;  %592 = vmatprep.subr.bf16.mxu1 %v718_v0  ;;  %v673_v31 = vld [vmem:[#allocation2 + $0xa0] sm:$0xff]   ;;  %v675_v33 = vld [vmem:[#allocation2 + $0xb0] sm:$0xff]   ;;  %v676_v34 = vld [vmem:[#allocation2 + $0xb8] sm:$0xff]  }
  0x1b   :  { %v677_v35 = vld [vmem:[#allocation2 + $0xc0] sm:$0xff]   ;;  %v678_v36 = vld [vmem:[#allocation2 + $0xc8] sm:$0xff]   ;;  %v679_v37 = vld [vmem:[#allocation2 + $0xd0] sm:$0xff]  }
  0x1c   :  { %v680_v38 = vld [vmem:[#allocation2 + $0xd8] sm:$0xff]   ;;  %v503_v39 = vld [vmem:[%s812_s2 + $0x1] ss:$0 sm:$0xff]  ;;  %v682_v48 = vld [vmem:[#allocation2 + $0xe8] sm:$0xff]  }
  0x1d   :  { %573 = vmatpush3.bf16.msra.mxu0 %v655_v3  ;;  %593 = vmatpush3.bf16.msra.mxu1 %v663_v8  ;;  %v681_v47 = vld [vmem:[#allocation2 + $0xe0] sm:$0xff]   ;;  %v683_v49 = vld [vmem:[#allocation2 + $0xf0] sm:$0xff]   ;;  %v684_v50 = vld [vmem:[#allocation2 + $0xf8] sm:$0xff]  }
  0x1e   :  { %574 = vmatprep.subr.bf16.mxu0 %v718_v0  ;;  %594 = vmatprep.subr.bf16.mxu1 %v718_v0  ;;  %v513_v51 = vld [vmem:[%s812_s2 + $0x2] ss:$0 sm:$0xff]  ;;  %v523_v59 = vld [vmem:[%s812_s2 + $0x3] ss:$0 sm:$0xff] }
  0x21   :  { %575 = vmatpush3.bf16.msra.mxu0 %v656_v5  ;;  %595 = vmatpush3.bf16.msra.mxu1 %v664_v10 }
  0x22   :  { %576 = vmatprep.subr.bf16.mxu0 %v718_v0  ;;  %596 = vmatprep.subr.bf16.mxu1 %v718_v0 }
  0x25   :  { %577 = vmatpush3.bf16.msra.mxu0 %v657_v7  ;;  %597 = vmatpush3.bf16.msra.mxu1 %v665_v15 }
  0x26   :  { %578 = vmatprep.subr.bf16.mxu0 %v718_v0  ;;  %598 = vmatprep.subr.bf16.mxu1 %v718_v0 }
  0x29   :  { %579 = vmatpush3.bf16.msra.mxu0 %v658_v9  ;;  %599 = vmatpush3.bf16.msra.mxu1 %v666_v16 }
  0x2a   :  { %580 = vmatprep.subr.bf16.mxu0 %v718_v0  ;;  %600 = vmatprep.subr.bf16.mxu1 %v718_v0 }
  0x2d   :  { %581 = vmatpush3.bf16.msra.mxu0 %v659_v11  ;;  %601 = vmatpush3.bf16.msra.mxu1 %v667_v17 }
  0x2e   :  { %582 = vmatprep.subr.bf16.mxu0 %v718_v0  ;;  %602 = vmatprep.subr.bf16.mxu1 %v718_v0 }
  0x31   :  { %583 = vmatpush3.bf16.msra.mxu0 %v660_v12  ;;  %603 = vmatpush3.bf16.msra.mxu1 %v668_v18 }
  0x32   :  { %608 = vmatprep.subr.bf16.mxu0 %v718_v0  ;;  %628 = vmatprep.subr.bf16.mxu1 %v718_v0 }
  0x34   :  { %585 = vmatmul.mubr.bf16.vlgmr.msra.gmra.mrb[0].mxu0 %v30_v14 }
  0x35   :  { %624 = vmatprep.mubr.msk.bf16.mxu0 %vm719_vm0, %v718_v0  ;;  %609 = vmatpush3.bf16.msra.mxu0 %v669_v19 }
  0x36   :  { %610 = vmatprep.subr.bf16.mxu0 %v718_v0 }
  0x39   :  { %611 = vmatpush3.bf16.msra.mxu0 %v670_v20 }
  0x3a   :  { %612 = vmatprep.subr.bf16.mxu0 %v718_v0 }
  0x3d   :  { %613 = vmatpush3.bf16.msra.mxu0 %v671_v21 }
  0x3e   :  { %614 = vmatprep.subr.bf16.mxu0 %v718_v0 }
  0x41   :  { %615 = vmatpush3.bf16.msra.mxu0 %v672_v22 }
  0x42   :  { %616 = vmatprep.subr.bf16.mxu0 %v718_v0 }
  0x45   :  { %617 = vmatpush3.bf16.msra.mxu0 %v673_v31 }
  0x46   :  { %618 = vmatprep.subr.bf16.mxu0 %v718_v0 }
  0x49   :  { %619 = vmatpush3.bf16.msra.mxu0 %v674_v32 }
  0x4a   :  { %620 = vmatprep.subr.bf16.mxu0 %v718_v0 }
  0x4d   :  { %621 = vmatpush3.bf16.msra.mxu0 %v675_v33 }
  0x4e   :  { %622 = vmatprep.subr.bf16.mxu0 %v718_v0 }
  0x51   :  { %623 = vmatpush3.bf16.msra.mxu0 %v676_v34 }
 0x107   :  { %v136_v24 = vpop.f32.mrb[0].mxu0 }
 0x108   :  { %v137_v25 = vadd.f32 %v493_v23, %v136_v24  ;;  %v586_v26 = vpop.f32.mrb[1].mxu0 }
 0x109   :  { %v139_v27 = vpop.f32.mrb[2].mxu0 }
 0x10a   :  { %685 = vtanh.f32 %v137_v25  ;;  %v587_v28 = vpop.f32.mrb[3].mxu0 }
 0x114   :  { %v686_v29 = vpop.eup %685 }
 0x115   :  { %v143_v30 = vpack.c.bf16 %v686_v29, %v686_v29 }
 0x117   :  { %605 = vmatmul.mubr.bf16.vlgmr.msra.gmra.mrb[0].mxu1 %v143_v30 }
 0x118   :  { %644 = vmatprep.mubr.msk.bf16.mxu1 %vm719_vm0, %v718_v0  ;;  %629 = vmatpush3.bf16.msra.mxu1 %v677_v35 }
 0x119   :  { %630 = vmatprep.subr.bf16.mxu1 %v718_v0 }
 0x11c   :  { %631 = vmatpush3.bf16.msra.mxu1 %v678_v36 }
 0x11d   :  { %632 = vmatprep.subr.bf16.mxu1 %v718_v0 }
 0x120   :  { %633 = vmatpush3.bf16.msra.mxu1 %v679_v37 }
 0x121   :  { %634 = vmatprep.subr.bf16.mxu1 %v718_v0 }
 0x124   :  { %635 = vmatpush3.bf16.msra.mxu1 %v680_v38 }
 0x125   :  { %636 = vmatprep.subr.bf16.mxu1 %v718_v0 }
 0x128   :  { %637 = vmatpush3.bf16.msra.mxu1 %v681_v47 }
 0x129   :  { %638 = vmatprep.subr.bf16.mxu1 %v718_v0 }
 0x12c   :  { %639 = vmatpush3.bf16.msra.mxu1 %v682_v48 }
 0x12d   :  { %640 = vmatprep.subr.bf16.mxu1 %v718_v0 }
 0x130   :  { %641 = vmatpush3.bf16.msra.mxu1 %v683_v49 }
 0x131   :  { %642 = vmatprep.subr.bf16.mxu1 %v718_v0 }
 0x134   :  { %643 = vmatpush3.bf16.msra.mxu1 %v684_v50 }
 0x1ea   :  { %v251_v40 = vpop.f32.mrb[0].mxu1 }
 0x1eb   :  { %v252_v41 = vadd.f32 %v503_v39, %v251_v40  ;;  %v606_v42 = vpop.f32.mrb[1].mxu1 }
 0x1ec   :  { %v254_v43 = vpop.f32.mrb[2].mxu1 }
 0x1ed   :  { %687 = vtanh.f32 %v252_v41  ;;  %v607_v44 = vpop.f32.mrb[3].mxu1 }
 0x1f7   :  { %v688_v45 = vpop.eup %687 }
 0x1f8   :  { %v258_v46 = vpack.c.bf16 %v688_v45, %v688_v45 }
 0x1fa   :  { %625 = vmatmul.mubr.bf16.vlgmr.msra.gmra.mrb[4].mxu0 %v258_v46 }
 0x2cd   :  { %v366_v52 = vpop.f32.mrb[4].mxu0 }
 0x2ce   :  { %v367_v53 = vadd.f32 %v513_v51, %v366_v52  ;;  %v626_v54 = vpop.f32.mrb[5].mxu0 }
 0x2cf   :  { %v369_v55 = vpop.f32.mrb[6].mxu0 }
 0x2d0   :  { %689 = vtanh.f32 %v367_v53  ;;  %v627_v56 = vpop.f32.mrb[7].mxu0 }
 0x2da   :  { %v690_v57 = vpop.eup %689 }
 0x2db   :  { %v373_v58 = vpack.c.bf16 %v690_v57, %v690_v57 }
 0x2dd   :  { %645 = vmatmul.mubr.bf16.vlgmr.msra.gmra.mrb[4].mxu1 %v373_v58 }
 0x3b0   :  { %v481_v60 = vpop.f32.mrb[4].mxu1 }
 0x3b1   :  { %v482_v61 = vadd.f32 %v523_v59, %v481_v60  ;;  %v646_v62 = vpop.f32.mrb[5].mxu1 }
 0x3b2   :  { %v484_v63 = vpop.f32.mrb[6].mxu1 }
 0x3b3   :  { %487 = vst [vmem:[%s813_s3] sm:$0xff] %v482_v61  ;;  %v647_v0 = vpop.f32.mrb[7].mxu1 }
 0x3b4   :  { %492 = vsyncpa [#allocation3], 1 }

</bundles_post_ra>
